<compile_context>
chip_gen: v7x
topology: tpu7x:2x2x1
jax: 0.10.0
libtpu: 0.0.40
codegen_flags: <defaults>
</compile_context>

<pallas_src>
import functools

import numpy as np

import jax
import jax.numpy as jnp
from jax import lax
from jax.experimental import pallas as pl
from jax.experimental.pallas import tpu as pltpu


# ----------------------------------------------------------------------------
# Pallas kernel: fused-conv matmul -> square -> pool matmul -> clamp + log.
# ----------------------------------------------------------------------------
def shallow_convnet_kernel(x_ref, w_ref, pool_ref, out_ref):
    # x_ref    : (Kp, N)  im2col columns (+ ones row + zero pad), N = Bt*T
    # w_ref    : (F, Kp)  fused conv1*conv2*BN weights (+ bias column),
    #                     pre-scaled by 1/sqrt(pool_kernel)
    # pool_ref : (N, M)   block-diagonal 0/1 pooling matrix, M = Bt*T_out
    # out_ref  : (F, M)
    zn = jnp.dot(w_ref[...], x_ref[...], preferred_element_type=jnp.float32)
    sq = zn * zn                                       # = z^2 / pool_kernel
    pooled = jnp.dot(sq.astype(pool_ref.dtype), pool_ref[...],
                     preferred_element_type=jnp.float32)   # = AvgPool(z^2)
    out_ref[...] = jnp.log(jnp.maximum(pooled, 1e-6))


# ----------------------------------------------------------------------------
# Parameter fusion (done ONCE, outside the per-call path).
# ----------------------------------------------------------------------------
def prepare_fused_weights(params, *, kernel_size, pool_kernel,
                          compute_dtype=jnp.bfloat16):
    """Fuse temporal conv + spatial conv + inference BatchNorm into (F, Kp)."""
    w1, b1, w2, b2, gamma, beta, run_mean, run_var = params
    F = w1.shape[0]
    C = w2.shape[2]
    ks = kernel_size

    w1s = w1.reshape(F, ks).astype(jnp.float32)               # (F_in, ks)
    w2s = w2[:, :, :, 0].astype(jnp.float32)                  # (F_out, F_in, C)
    # Weff[o, c*ks + j] = sum_i w2[o,i,c] * w1[i,j]
    weff = jnp.einsum('oic,ij->ocj', w2s, w1s).reshape(F, C * ks)
    bias_conv = (jnp.einsum('oic,i->o', w2s, b1.astype(jnp.float32))
                 + b2.astype(jnp.float32))
    eps = 1e-5
    scale = (gamma / jnp.sqrt(run_var + eps)).astype(jnp.float32)
    w_fused = weff * scale[:, None]
    bias_fused = (scale * bias_conv + beta.astype(jnp.float32)
                  - scale * run_mean.astype(jnp.float32))
    w_aug = jnp.concatenate([w_fused, bias_fused[:, None]], axis=1)  # (F, K)

    # Fold 1/sqrt(pool_kernel) into the whole augmented matrix so the pooling
    # matrix can be a pure 0/1 summation matrix (exactly representable in bf16).
    w_aug = w_aug * (1.0 / float(np.sqrt(pool_kernel)))

    # Pad the contraction dim K (=C*ks+1) up to a multiple of 8 (sublane tile).
    K = C * ks + 1
    Kp = -(-K // 8) * 8
    if Kp > K:
        w_aug = jnp.pad(w_aug, ((0, 0), (0, Kp - K)))
    return w_aug.astype(compute_dtype)


def _pick_block_batch(B, T, T_out, itemsize, requested=None,
                      max_pool_bytes=4 << 20):
    if requested is not None:
        bt = max(1, min(requested, B))
    else:
        # Two grid steps: keeps both v7x TensorCores busy ("parallel" axis)
        # while adding only one extra fixed per-step overhead on v5e/v6e.
        bt = max(1, -(-B // 2))
    # The block-diagonal pooling matrix is O(Bt^2): cap it so it never
    # dominates the VMEM budget (v7x: 64 MiB physical; v5e: 16 MiB scoped).
    while bt > 1 and (bt * T) * (bt * T_out) * itemsize > max_pool_bytes:
        bt = max(1, bt // 2)
    return bt


# ----------------------------------------------------------------------------
# Wrapper: im2col, batch packing, pooling matrix, pallas_call.
# ----------------------------------------------------------------------------
def shallow_convnet_forward(x, w_aug, *, kernel_size, pool_kernel, pool_stride,
                            block_batch=None, compute_dtype=jnp.bfloat16):
    B, _, C, T = x.shape
    F, Kp = w_aug.shape
    ks, pk, ps = kernel_size, pool_kernel, pool_stride
    T_out = (T - pk) // ps + 1
    K = C * ks + 1
    itemsize = np.dtype(compute_dtype).itemsize

    Bt = _pick_block_batch(B, T, T_out, itemsize, block_batch)
    n_tiles = -(-B // Bt)
    Bp = n_tiles * Bt
    N = Bt * T
    M = Bt * T_out

    # ---- im2col with PyTorch padding='same' (left=(ks-1)//2), plus ones row.
    pad_l = (ks - 1) // 2
    pad_r = (ks - 1) - pad_l
    xc = x[:, 0].astype(compute_dtype)
    xp = jnp.pad(xc, ((0, 0), (0, 0), (pad_l, pad_r)))
    cols = jnp.stack([xp[:, :, j:j + T] for j in range(ks)], axis=2)  # (B,C,ks,T)
    pieces = [cols.reshape(B, C * ks, T),
              jnp.ones((B, 1, T), compute_dtype)]
    if Kp > K:
        pieces.append(jnp.zeros((B, Kp - K, T), compute_dtype))
    x_aug = jnp.concatenate(pieces, axis=1)                           # (B, Kp, T)
    if Bp > B:
        x_aug = jnp.pad(x_aug, ((0, Bp - B), (0, 0), (0, 0)))
    x_tiled = (x_aug.reshape(n_tiles, Bt, Kp, T)
               .transpose(0, 2, 1, 3)
               .reshape(n_tiles, Kp, N))

    # ---- block-diagonal 0/1 pooling matrix: static -> baked numpy constant.
    t_idx = np.arange(T)[:, None]
    start = (np.arange(T_out) * ps)[None, :]
    pool_mat = ((t_idx >= start) & (t_idx < start + pk)).astype(np.float32)
    pool_block = jnp.asarray(np.kron(np.eye(Bt, dtype=np.float32), pool_mat),
                             dtype=compute_dtype)                     # (N, M)

    # ---- VMEM budget (x double-buffered, w/pool single-buffered, out f32).
    vmem_est = (2 * Kp * N * itemsize + F * Kp * itemsize
                + N * M * itemsize + 2 * F * M * 4)
    vmem_limit = int(min(max(4 * vmem_est, 16 * 1024 * 1024), 48 * 1024 * 1024))

    cost = pl.CostEstimate(
        flops=int(n_tiles * (2 * F * Kp * N + 2 * F * N * M + F * N)),
        transcendentals=int(n_tiles * F * M),
        bytes_accessed=int(n_tiles * Kp * N * itemsize + F * Kp * itemsize
                           + N * M * itemsize + n_tiles * F * M * 4),
    )

    out = pl.pallas_call(
        shallow_convnet_kernel,
        out_shape=jax.ShapeDtypeStruct((n_tiles, F, M), jnp.float32),
        grid_spec=pltpu.PrefetchScalarGridSpec(
            num_scalar_prefetch=0,
            grid=(n_tiles,),
            in_specs=[
                pl.BlockSpec((pl.Squeezed(), Kp, N), lambda b: (b, 0, 0)),
                pl.BlockSpec((F, Kp), lambda b: (0, 0),
                             pipeline_mode=pl.Buffered(1)),
                pl.BlockSpec((N, M), lambda b: (0, 0),
                             pipeline_mode=pl.Buffered(1)),
            ],
            out_specs=pl.BlockSpec((pl.Squeezed(), F, M), lambda b: (b, 0, 0)),
        ),
        compiler_params=pltpu.CompilerParams(
            dimension_semantics=("parallel",),
            vmem_limit_bytes=vmem_limit),
        cost_estimate=cost,
    )(x_tiled, w_aug, pool_block)

    # (n_tiles, F, Bt*T_out) -> (B, F*T_out), matching torch NCHW flatten order.
    out = (out.reshape(n_tiles, F, Bt, T_out)
           .transpose(0, 2, 1, 3)
           .reshape(Bp, F * T_out))
    return out[:B]


# ----------------------------------------------------------------------------
# Pure-JAX reference (independent path) for the correctness check.
# ----------------------------------------------------------------------------
def reference_forward(x, params, *, kernel_size, pool_kernel, pool_stride):
    w1, b1, w2, b2, gamma, beta, run_mean, run_var = params
    ks, pk, ps = kernel_size, pool_kernel, pool_stride
    pad_l = (ks - 1) // 2
    pad_r = (ks - 1) - pad_l
    dn = ("NCHW", "OIHW", "NCHW")
    y = lax.conv_general_dilated(x, w1, (1, 1), [(0, 0), (pad_l, pad_r)],
                                 dimension_numbers=dn)
    y = y + b1.reshape(1, -1, 1, 1)
    z = lax.conv_general_dilated(y, w2, (1, 1), "VALID", dimension_numbers=dn)
    z = z + b2.reshape(1, -1, 1, 1)
    eps = 1e-5
    zn = ((z - run_mean.reshape(1, -1, 1, 1))
          / jnp.sqrt(run_var.reshape(1, -1, 1, 1) + eps)
          * gamma.reshape(1, -1, 1, 1) + beta.reshape(1, -1, 1, 1))
    sq = zn * zn
    p = lax.reduce_window(sq, 0.0, lax.add,
                          (1, 1, 1, pk), (1, 1, 1, ps), "VALID") / pk
    out = jnp.log(jnp.maximum(p, 1e-6))
    return out.reshape(x.shape[0], -1)


def torch_renorm_dim0(w, max_norm=2.0):
    # torch.renorm(w, p=2, dim=0, maxnorm): clip per-output-filter L2 norm.
    flat = w.reshape(w.shape[0], -1)
    norms = jnp.sqrt(jnp.sum(flat * flat, axis=1, keepdims=True))
    scale = jnp.where(norms > max_norm, max_norm / jnp.maximum(norms, 1e-12), 1.0)
    return (flat * scale).reshape(w.shape)


if __name__ == "__main__":
    # Small, module-consistent configuration.
    batch = 16
    num_channels = 4          # EEG electrodes
    temporal_size = 64        # time samples
    sampling_rate = 50
    kernel_size = int(sampling_rate * 0.16)      # 8
    pool_kernel = int(sampling_rate * 0.3)       # 15
    pool_stride = int(sampling_rate * 0.06)      # 3
    F = 40

    key = jax.random.PRNGKey(0)
    ks_ = jax.random.split(key, 9)
    x = jax.random.normal(ks_[0], (batch, 1, num_channels, temporal_size),
                          dtype=jnp.float32)

    # Deterministic synthetic parameters (with max_norm=2.0 weight constraint).
    w1 = torch_renorm_dim0(
        0.3 * jax.random.normal(ks_[1], (F, 1, 1, kernel_size), jnp.float32))
    b1 = 0.1 * jax.random.normal(ks_[2], (F,), jnp.float32)
    w2 = torch_renorm_dim0(
        0.1 * jax.random.normal(ks_[3], (F, F, num_channels, 1), jnp.float32))
    b2 = 0.1 * jax.random.normal(ks_[4], (F,), jnp.float32)
    gamma = 1.0 + 0.1 * jax.random.normal(ks_[5], (F,), jnp.float32)
    beta = 0.1 * jax.random.normal(ks_[6], (F,), jnp.float32)
    run_mean = 0.1 * jax.random.normal(ks_[7], (F,), jnp.float32)
    run_var = jnp.abs(1.0 + 0.1 * jax.random.normal(ks_[8], (F,), jnp.float32))
    params = (w1, b1, w2, b2, gamma, beta, run_mean, run_var)

    ref = jax.block_until_ready(
        reference_forward(x, params, kernel_size=kernel_size,
                          pool_kernel=pool_kernel, pool_stride=pool_stride))
    T_out = (temporal_size - pool_kernel) // pool_stride + 1

    # ---- exact f32 path: tight tolerance vs. the lax.conv reference.
    w_aug_f32 = prepare_fused_weights(params, kernel_size=kernel_size,
                                      pool_kernel=pool_kernel,
                                      compute_dtype=jnp.float32)
    fwd_f32 = jax.jit(functools.partial(
        shallow_convnet_forward, kernel_size=kernel_size,
        pool_kernel=pool_kernel, pool_stride=pool_stride,
        compute_dtype=jnp.float32))
    out_f32 = jax.block_until_ready(fwd_f32(x, w_aug_f32))
    assert out_f32.shape == (batch, F * T_out)
    assert jnp.allclose(out_f32, ref, rtol=1e-3, atol=1e-3), "f32 mismatch vs reference"

    # ---- bf16 MXU-operand path (halved DMA bytes; MXU-native on v6e/v7x).
    w_aug_bf16 = prepare_fused_weights(params, kernel_size=kernel_size,
                                       pool_kernel=pool_kernel,
                                       compute_dtype=jnp.bfloat16)
    fwd_bf16 = jax.jit(functools.partial(
        shallow_convnet_forward, kernel_size=kernel_size,
        pool_kernel=pool_kernel, pool_stride=pool_stride,
        compute_dtype=jnp.bfloat16))
    out_bf16 = jax.block_until_ready(fwd_bf16(x, w_aug_bf16))
    assert out_bf16.shape == (batch, F * T_out)
    assert jnp.allclose(out_bf16, ref, rtol=2e-2, atol=2e-2), "bf16 mismatch vs reference"

    print("KERNEL_OK")
</pallas_src>

<mosaic_0001>
module attributes {stable_mosaic.version = 11 : i64} {
  func.func @shallow_convnet_kernel(%arg0: i32, %arg1: memref<1x40x512xf32, #tpu.memory_space<vmem>>, %arg2: memref<40x40xf32, #tpu.memory_space<vmem>>, %arg3: memref<512x136xf32, #tpu.memory_space<vmem>>, %arg4: memref<1x40x136xf32, #tpu.memory_space<vmem>>) attributes {dimension_semantics = [#tpu.dimension_semantics<parallel>], iteration_bounds = array<i64: 2>, scalar_prefetch = 0 : i64, scratch_operands = 0 : i64, tpu.core_type = #tpu.core_type<tc>, window_params = [{transform_indices = @transform_0, window_bounds = array<i64: 1, 40, 512>}, {pipeline_mode = #tpu.pipeline_mode<synchronous>, transform_indices = @transform_1, window_bounds = array<i64: 40, 40>}, {pipeline_mode = #tpu.pipeline_mode<synchronous>, transform_indices = @transform_2, window_bounds = array<i64: 512, 136>}, {transform_indices = @transform_3, window_bounds = array<i64: 1, 40, 136>}]} {
    %c0 = arith.constant 0 : index
    %c0_0 = arith.constant 0 : index
    %0 = vector.load %arg2[%c0, %c0_0] : memref<40x40xf32, #tpu.memory_space<vmem>>, vector<40x40xf32>
    %c0_1 = arith.constant 0 : index
    %c0_2 = arith.constant 0 : index
    %c0_3 = arith.constant 0 : index
    %1 = vector.load %arg1[%c0_1, %c0_2, %c0_3] : memref<1x40x512xf32, #tpu.memory_space<vmem>>, vector<1x40x512xf32>
    %2 = vector.shape_cast %1 : vector<1x40x512xf32> to vector<40x512xf32>
    %cst = arith.constant dense<0.000000e+00> : vector<40x512xf32>
    %3 = tpu.matmul %0, %2, %cst {dimension_numbers = #tpu.dot_dimension_numbers<[1], [0], [0], [1], [0, 0, 1, 1], [], []>} : vector<40x40xf32>, vector<40x512xf32>, vector<40x512xf32> -> vector<40x512xf32>
    %4 = arith.mulf %3, %3 : vector<40x512xf32>
    %c0_4 = arith.constant 0 : index
    %c0_5 = arith.constant 0 : index
    %5 = vector.load %arg3[%c0_4, %c0_5] : memref<512x136xf32, #tpu.memory_space<vmem>>, vector<512x136xf32>
    %cst_6 = arith.constant dense<0.000000e+00> : vector<40x136xf32>
    %6 = tpu.matmul %4, %5, %cst_6 {dimension_numbers = #tpu.dot_dimension_numbers<[1], [0], [0], [1], [0, 0, 1, 1], [], []>} : vector<40x512xf32>, vector<512x136xf32>, vector<40x136xf32> -> vector<40x136xf32>
    %cst_7 = arith.constant 9.99999997E-7 : f32
    %7 = vector.broadcast %cst_7 : f32 to vector<40x136xf32>
    %8 = arith.maximumf %6, %7 : vector<40x136xf32>
    %9 = math.log %8 : vector<40x136xf32>
    %c0_8 = arith.constant 0 : index
    %c0_9 = arith.constant 0 : index
    %c0_10 = arith.constant 0 : index
    %10 = vector.load %arg4[%c0_8, %c0_9, %c0_10] : memref<1x40x136xf32, #tpu.memory_space<vmem>>, vector<1x40x136xf32>
    %11 = vector.shape_cast %10 : vector<1x40x136xf32> to vector<40x136xf32>
    %12 = vector.shape_cast %9 : vector<40x136xf32> to vector<1x40x136xf32>
    tpu.vector_store %arg4[%c0_8, %c0_9, %c0_10], %12 {strides = array<i32>} : memref<1x40x136xf32, #tpu.memory_space<vmem>>, vector<1x40x136xf32>,
    return
  }
  func.func @transform_0(%arg0: i32) -> (i32, i32, i32) {
    %c0_i32 = arith.constant 0 : i32
    %c0_i32_0 = arith.constant 0 : i32
    %c0_i32_1 = arith.constant 0 : i32
    return %arg0, %c0_i32, %c0_i32_0 : i32, i32, i32
  }
  func.func @transform_1(%arg0: i32) -> (i32, i32) {
    %c0_i32 = arith.constant 0 : i32
    %c0_i32_0 = arith.constant 0 : i32
    %c0_i32_1 = arith.constant 0 : i32
    return %c0_i32, %c0_i32_0 : i32, i32
  }
  func.func @transform_2(%arg0: i32) -> (i32, i32) {
    %c0_i32 = arith.constant 0 : i32
    %c0_i32_0 = arith.constant 0 : i32
    %c0_i32_1 = arith.constant 0 : i32
    return %c0_i32, %c0_i32_0 : i32, i32
  }
  func.func @transform_3(%arg0: i32) -> (i32, i32, i32) {
    %c0_i32 = arith.constant 0 : i32
    %c0_i32_0 = arith.constant 0 : i32
    %c0_i32_1 = arith.constant 0 : i32
    return %arg0, %c0_i32, %c0_i32_0 : i32, i32, i32
  }
}

</mosaic_0001>

<bundles_post_ra>
// kernel: shallow_convnet_forward.1
= control target key start
LH: loop header
LB: loop body
LE: loop exit
PB: predicated region body
PF: predicated region fallthrough
CT: control target
= control target key end

     0   :  { %s1069_s12 = smov 0   ;;  %s1548_s0 = inlined_call_operand.vmem [shape: f32[2,40,512], index: 0, kind: input, shape index: {}]   ;;  %s1549_s1 = inlined_call_operand.vmem [shape: f32[40,40], index: 1, kind: input, shape index: {}]   ;;  %s1550_s2 = inlined_call_operand.vmem [shape: f32[512,136], index: 2, kind: input, shape index: {}]   ;;  %s1551_s3 = inlined_call_operand.vmem [shape: f32[2,40,136], index: 3, kind: output, shape index: {}]  }
   0x1 LB: > { %s836_s13 = sadd.s32 4294967295, %s1046_s12   ;;  %p840_p0 = scmp.ge.s32.totalorder %s1046_s12, 1  ;;  %s1046_s12 = sphi %s1069_s12, %s13_s12  }
   0x2   : > { %p137_p1 = scmp.lt.s32.totalorder %s1046_s12, 3 }
   0x4   : > { %p138_p2 = pnand %p840_p0, %p137_p1 }
   0x5   : > { %p161_p3 = scmp.lt.s32.totalorder (!%p138_p2), %s836_s13, 1  ;;  %v1048_v0 = vmov (!%p138_p2), 0.0   ;;  %v423_v27 = vld [vmem:[%s1550_s2 + $0x8] sm:$0xff] (!%p138_p2)  ;;  %v171_v28 = vld [vmem:[%s1549_s1] sm:$0xff] (!%p138_p2)  ;;  %v425_v29 = vld [vmem:[%s1550_s2 + $0x18] sm:$0xff] (!%p138_p2)  ;;  %vm196_vm0 = vcmask (!%p138_p2), 326656  }
   0x6   : > { %141 = sbr.rel (%p138_p2) target bundleno = 495 (0x1ef), region = 32  ;;  %276 = vmatprep.mubr.f32.mxu0 (!%p138_p2), %v1048_v0  ;;  %371 = vmatprep.mubr.f32.mxu1 (!%p138_p2), %v1048_v0  ;;  %v487_v30 = vld [vmem:[%s1550_s2 + $0x208] sm:$0xff] (!%p138_p2)  ;;  %v489_v31 = vld [vmem:[%s1550_s2 + $0x218] sm:$0xff] (!%p138_p2)  ;;  %v422_v33 = vld [vmem:[%s1550_s2] sm:$0xff] (!%p138_p2)  ;;  %v871_v38 = vpack.c.bf16 (!%p138_p2), %v425_v29, %v423_v27  ;;  %vm771_vm1 = vcmask (!%p138_p2), 64512  }
   0x7   : > { %v424_v34 = vld [vmem:[%s1550_s2 + $0x10] sm:$0xff] (!%p138_p2)  ;;  %v427_v36 = vld [vmem:[%s1550_s2 + $0x28] sm:$0xff] (!%p138_p2)  ;;  %v429_v37 = vld [vmem:[%s1550_s2 + $0x38] sm:$0xff] (!%p138_p2)  ;;  %v935_v39 = vpack.c.bf16 (!%p138_p2), %v489_v31, %v487_v30 }
   0x8   : > { %v873_v40 = vpack.c.bf16 (!%p138_p2), %v424_v34, %v422_v33  ;;  %v486_v41 = vld [vmem:[%s1550_s2 + $0x200] sm:$0xff] (!%p138_p2)  ;;  %v488_v42 = vld [vmem:[%s1550_s2 + $0x210] sm:$0xff] (!%p138_p2)  ;;  %v491_v43 = vld [vmem:[%s1550_s2 + $0x228] sm:$0xff] (!%p138_p2)  ;;  %v875_v44 = vpack.c.bf16 (!%p138_p2), %v429_v37, %v427_v36 }
   0x9   : > { %v493_v45 = vld [vmem:[%s1550_s2 + $0x238] sm:$0xff] (!%p138_p2)  ;;  %v426_v46 = vld [vmem:[%s1550_s2 + $0x20] sm:$0xff] (!%p138_p2)  ;;  %v428_v47 = vld [vmem:[%s1550_s2 + $0x30] sm:$0xff] (!%p138_p2)  ;;  %v937_v51 = vpack.c.bf16 (!%p138_p2), %v488_v42, %v486_v41 }
   0xa   : > { %v172_v48 = vld [vmem:[%s1549_s1 + $0x8] sm:$0xff] (!%p138_p2)  ;;  %v433_v50 = vld [vmem:[%s1550_s2 + $0x58] sm:$0xff] (!%p138_p2)  ;;  %v939_v52 = vpack.c.bf16 (!%p138_p2), %v493_v45, %v491_v43  ;;  %v877_v53 = vpack.c.bf16 (!%p138_p2), %v428_v47, %v426_v46  ;;  %v490_v54 = vld [vmem:[%s1550_s2 + $0x220] sm:$0xff] (!%p138_p2) }
   0xb   : > { %v431_v49 = vld [vmem:[%s1550_s2 + $0x48] sm:$0xff] (!%p138_p2)  ;;  %v492_v55 = vld [vmem:[%s1550_s2 + $0x230] sm:$0xff] (!%p138_p2)  ;;  %v497_v58 = vld [vmem:[%s1550_s2 + $0x258] sm:$0xff] (!%p138_p2) }
   0xc   : > { %v495_v56 = vld [vmem:[%s1550_s2 + $0x248] sm:$0xff] (!%p138_p2)  ;;  %v879_v57 = vpack.c.bf16 (!%p138_p2), %v433_v50, %v431_v49  ;;  %v430_v59 = vld [vmem:[%s1550_s2 + $0x40] sm:$0xff] (!%p138_p2)  ;;  %v432_v60 = vld [vmem:[%s1550_s2 + $0x50] sm:$0xff] (!%p138_p2) }
   0xd   : > { %s1553_s13 = smov (!%p161_p3, %s836_s13), 1  ;;  %v173_v61 = vld [vmem:[%s1549_s1 + $0x10] sm:$0xff]  ;;  %v435_v62 = vld [vmem:[%s1550_s2 + $0x68] sm:$0xff]  ;;  %v437_v63 = vld [vmem:[%s1550_s2 + $0x78] sm:$0xff] }
   0xe   : > { %s1009_s14 = smul.u32 160, %s1553_s13  ;;  %v502_v30 = vld [vmem:[%s1550_s2 + $0x280] sm:$0xff]  ;;  %v504_v31 = vld [vmem:[%s1550_s2 + $0x290] sm:$0xff]  ;;  %v509_v33 = vld [vmem:[%s1550_s2 + $0x2b8] sm:$0xff] }
   0xf   : > { %v442_v34 = vld [vmem:[%s1550_s2 + $0xa0] sm:$0xff]  ;;  %v447_v36 = vld [vmem:[%s1550_s2 + $0xc8] sm:$0xff]  ;;  %v449_v37 = vld [vmem:[%s1550_s2 + $0xd8] sm:$0xff]  ;;  %s1010_s7 = smul.u32 80, %s1553_s13 }
  0x10   : > { %s1085_s17 = scalar_lea.vmem %s1548_s0, %s1009_s14  ;;  %v506_v41 = vld [vmem:[%s1550_s2 + $0x2a0] sm:$0xff]  ;;  %v508_v42 = vld [vmem:[%s1550_s2 + $0x2b0] sm:$0xff]  ;;  %v511_v43 = vld [vmem:[%s1550_s2 + $0x2c8] sm:$0xff] }
  0x11   : > { %v177_v1 = vld [vmem:[%s1085_s17 + $0x8] sm:$0xff]  ;;  %v179_v3 = vld [vmem:[%s1085_s17 + $0x18] sm:$0xff]  ;;  %v176_v6 = vld [vmem:[%s1085_s17] sm:$0xff]  ;;  %v957_v50 = vpack.c.bf16 %v508_v42, %v506_v41  ;;  %s1528_s10 = scalar_lea.vmem %s1551_s3, %s1010_s7 }
  0x12   : > { %v181_v2 = vld [vmem:[%s1085_s17 + $0x28] sm:$0xff]  ;;  %v183_v5 = vld [vmem:[%s1085_s17 + $0x38] sm:$0xff]  ;;  %v180_v7 = vld [vmem:[%s1085_s17 + $0x20] sm:$0xff] }
  0x13   : > { %v855_v4 = vpack.c.bf16 %v181_v2, %v177_v1  ;;  %v863_v8 = vpack.c.bf16 %v183_v5, %v179_v3  ;;  %v857_v9 = vpack.c.bf16 %v180_v7, %v176_v6  ;;  %v178_v10 = vld [vmem:[%s1085_s17 + $0x10] sm:$0xff]  ;;  %v185_v12 = vld [vmem:[%s1085_s17 + $0x48] sm:$0xff]  ;;  %v187_v15 = vld [vmem:[%s1085_s17 + $0x58] sm:$0xff]  ;;  %v941_v1 = vpack.c.bf16 %v492_v55, %v490_v54 }
  0x14   : > { %v182_v11 = vld [vmem:[%s1085_s17 + $0x30] sm:$0xff]  ;;  %v189_v14 = vld [vmem:[%s1085_s17 + $0x68] sm:$0xff]  ;;  %v191_v16 = vld [vmem:[%s1085_s17 + $0x78] sm:$0xff]  ;;  %v943_v2 = vpack.c.bf16 %v497_v58, %v495_v56  ;;  %v881_v3 = vpack.c.bf16 %v432_v60, %v430_v59  ;;  %v883_v7 = vpack.c.bf16 %v437_v63, %v435_v62 }
  0x15   : > { %856 = vmatprep.subr.bf16.mxu0 %v855_v4  ;;  %v865_v13 = vpack.c.bf16 %v182_v11, %v178_v10  ;;  %864 = vmatprep.subr.bf16.mxu1 %v863_v8  ;;  %v859_v17 = vpack.c.bf16 %v189_v14, %v185_v12  ;;  %v867_v18 = vpack.c.bf16 %v191_v16, %v187_v15  ;;  %v184_v19 = vld [vmem:[%s1085_s17 + $0x40] sm:$0xff]  ;;  %v186_v21 = vld [vmem:[%s1085_s17 + $0x50] sm:$0xff]  ;;  %v193_v25 = vld [vmem:[%s1085_s17 + $0x88] sm:$0xff] }
  0x16   : > { %858 = vmatpush1.bf16.msra.mxu0 %v857_v9  ;;  %v188_v20 = vld [vmem:[%s1085_s17 + $0x60] sm:$0xff]  ;;  %v190_v23 = vld [vmem:[%s1085_s17 + $0x70] sm:$0xff]  ;;  %v195_v26 = vld [vmem:[%s1085_s17 + $0x98] sm:$0xff] }
  0x17   : > { %866 = vmatpush1.bf16.msra.mxu1 %v865_v13  ;;  %v861_v22 = vpack.c.bf16 %v188_v20, %v184_v19  ;;  %860 = vmatprep.subr.bf16.mxu0 %v859_v17  ;;  %v869_v24 = vpack.c.bf16 %v190_v23, %v186_v21  ;;  %v192_v32 = vld [vmem:[%s1085_s17 + $0x80] sm:$0xff]  ;;  %v194_v35 = vld [vmem:[%s1085_s17 + $0x90] sm:$0xff]  ;;  %v499_v6 = vld [vmem:[%s1550_s2 + $0x268] sm:$0xff] }
  0x18   : > { %868 = vmatprep.subr.bf16.mxu1 %v867_v18  ;;  %v494_v4 = vld [vmem:[%s1550_s2 + $0x240] sm:$0xff]  ;;  %v496_v5 = vld [vmem:[%s1550_s2 + $0x250] sm:$0xff]  ;;  %v501_v8 = vld [vmem:[%s1550_s2 + $0x278] sm:$0xff] }
  0x19   : > { %v434_v9 = vld [vmem:[%s1550_s2 + $0x60] sm:$0xff]  ;;  %v436_v10 = vld [vmem:[%s1550_s2 + $0x70] sm:$0xff]  ;;  %v174_v11 = vld [vmem:[%s1549_s1 + $0x18] sm:$0xff]  ;;  %v945_v14 = vpack.c.bf16 %v496_v5, %v494_v4  ;;  %v947_v15 = vpack.c.bf16 %v501_v8, %v499_v6 }
  0x1a   : > { %862 = vmatpush1.bf16.msra.mxu0 %v861_v22  ;;  %v439_v12 = vld [vmem:[%s1550_s2 + $0x88] sm:$0xff]  ;;  %v441_v13 = vld [vmem:[%s1550_s2 + $0x98] sm:$0xff]  ;;  %v885_v16 = vpack.c.bf16 %v436_v10, %v434_v9  ;;  %v498_v17 = vld [vmem:[%s1550_s2 + $0x260] sm:$0xff] }
  0x1b   : > { %870 = vmatpush1.bf16.msra.mxu1 %v869_v24  ;;  %220 = vmatprep.subr.mxu0 %v193_v25  ;;  %v500_v18 = vld [vmem:[%s1550_s2 + $0x270] sm:$0xff]  ;;  %v503_v19 = vld [vmem:[%s1550_s2 + $0x288] sm:$0xff]  ;;  %v887_v20 = vpack.c.bf16 %v441_v13, %v439_v12  ;;  %v505_v21 = vld [vmem:[%s1550_s2 + $0x298] sm:$0xff] }
  0x1c   : > { %315 = vmatprep.subr.mxu1 %v195_v26  ;;  %v438_v22 = vld [vmem:[%s1550_s2 + $0x80] sm:$0xff]  ;;  %v440_v23 = vld [vmem:[%s1550_s2 + $0x90] sm:$0xff]  ;;  %v443_v25 = vld [vmem:[%s1550_s2 + $0xa8] sm:$0xff]  ;;  %v949_v27 = vpack.c.bf16 %v500_v18, %v498_v17 }
  0x1d   : > { %v175_v24 = vld [vmem:[%s1549_s1 + $0x20] sm:$0xff]  ;;  %v445_v26 = vld [vmem:[%s1550_s2 + $0xb8] sm:$0xff]  ;;  %v889_v29 = vpack.c.bf16 %v440_v23, %v438_v22  ;;  %v448_v47 = vld [vmem:[%s1550_s2 + $0xd0] sm:$0xff] }
  0x1e   : > { %221 = vmatpush1.msra.mxu0 %v192_v32  ;;  %v507_v32 = vld [vmem:[%s1550_s2 + $0x2a8] sm:$0xff]  ;;  %v513_v45 = vld [vmem:[%s1550_s2 + $0x2d8] sm:$0xff]  ;;  %v446_v46 = vld [vmem:[%s1550_s2 + $0xc0] sm:$0xff] }
  0x1f   : > { %316 = vmatpush1.msra.mxu1 %v194_v35  ;;  %843 = vmatmul.mubr.msk.f32.vlgmr.msra.gmra.mrb[0].mxu0 %vm196_vm0, %v171_v28  ;;  %v444_v35 = vld [vmem:[%s1550_s2 + $0xb0] sm:$0xff]  ;;  %v453_v49 = vld [vmem:[%s1550_s2 + $0xf8] sm:$0xff]  ;;  %v515_v55 = vld [vmem:[%s1550_s2 + $0x2e8] sm:$0xff] }
  0x20   : > { %848 = vmatmul.mubr.msk.f32.vlgmr.msra.gmra.mrb[0].mxu1 %vm196_vm0, %v171_v28  ;;  %282 = vmatprep.mubr.f32.mxu0 %v1048_v0  ;;  %v951_v28 = vpack.c.bf16 %v505_v21, %v503_v19  ;;  %v512_v54 = vld [vmem:[%s1550_s2 + $0x2d0] sm:$0xff]  ;;  %v450_v58 = vld [vmem:[%s1550_s2 + $0xe0] sm:$0xff]  ;;  %v455_v60 = vld [vmem:[%s1550_s2 + $0x108] sm:$0xff] }
  0x21   : > { %377 = vmatprep.mubr.f32.mxu1 %v1048_v0  ;;  %872 = vmatprep.subr.bf16.mxu1 %v871_v38  ;;  %v953_v38 = vpack.c.bf16 %v504_v31, %v502_v30  ;;  %v452_v59 = vld [vmem:[%s1550_s2 + $0xf0] sm:$0xff]  ;;  %v519_v4 = vld [vmem:[%s1550_s2 + $0x308] sm:$0xff]  ;;  %v521_v6 = vld [vmem:[%s1550_s2 + $0x318] sm:$0xff] }
  0x22   : > { %936 = vmatprep.subr.bf16.mxu0 %v935_v39  ;;  %874 = vmatpush1.bf16.msra.mxu1 %v873_v40  ;;  %v955_v39 = vpack.c.bf16 %v509_v33, %v507_v32  ;;  %v893_v40 = vpack.c.bf16 %v444_v35, %v442_v34  ;;  %v456_v8 = vld [vmem:[%s1550_s2 + $0x110] sm:$0xff]  ;;  %v459_v9 = vld [vmem:[%s1550_s2 + $0x128] sm:$0xff]  ;;  %v461_v10 = vld [vmem:[%s1550_s2 + $0x138] sm:$0xff]  ;;  %v967_v12 = vpack.c.bf16 %v521_v6, %v519_v4 }
  0x23   : > { %844 = vmatmul.mubr.msk.f32.gmra.mrb[2].mxu0 %vm196_vm0, %v172_v48  ;;  %876 = vmatprep.subr.bf16.mxu1 %v875_v44  ;;  %v895_v44 = vpack.c.bf16 %v449_v37, %v447_v36  ;;  %v907_v17 = vpack.c.bf16 %v461_v10, %v459_v9  ;;  %v525_v18 = vld [vmem:[%s1550_s2 + $0x338] sm:$0xff]  ;;  %v458_v19 = vld [vmem:[%s1550_s2 + $0x120] sm:$0xff]  ;;  %v463_v21 = vld [vmem:[%s1550_s2 + $0x148] sm:$0xff] }
  0x24   : > { %849 = vmatmul.mubr.msk.f32.gmra.mrb[2].mxu1 %vm196_vm0, %v172_v48  ;;  %288 = vmatprep.mubr.f32.mxu0 %v1048_v0  ;;  %v451_v48 = vld [vmem:[%s1550_s2 + $0xe8] sm:$0xff]  ;;  %v465_v22 = vld [vmem:[%s1550_s2 + $0x158] sm:$0xff]  ;;  %v462_v31 = vld [vmem:[%s1550_s2 + $0x140] sm:$0xff] }
  0x25   : > { %383 = vmatprep.mubr.f32.mxu1 %v1048_v0  ;;  %938 = vmatpush1.bf16.msra.mxu0 %v937_v51  ;;  %v959_v51 = vpack.c.bf16 %v513_v45, %v511_v43  ;;  %v899_v56 = vpack.c.bf16 %v453_v49, %v451_v48  ;;  %v529_v30 = vld [vmem:[%s1550_s2 + $0x358] sm:$0xff]  ;;  %v464_v32 = vld [vmem:[%s1550_s2 + $0x150] sm:$0xff]  ;;  %v526_v37 = vld [vmem:[%s1550_s2 + $0x340] sm:$0xff] }
  0x26   : > { %940 = vmatprep.subr.bf16.mxu0 %v939_v52  ;;  %878 = vmatpush1.bf16.msra.mxu1 %v877_v53  ;;  %v897_v52 = vpack.c.bf16 %v448_v47, %v446_v46  ;;  %v510_v53 = vld [vmem:[%s1550_s2 + $0x2c0] sm:$0xff]  ;;  %v469_v33 = vld [vmem:[%s1550_s2 + $0x178] sm:$0xff]  ;;  %v913_v36 = vpack.c.bf16 %v464_v32, %v462_v31  ;;  %v468_v43 = vld [vmem:[%s1550_s2 + $0x170] sm:$0xff] }
  0x27   : > { %845 = vmatmul.mubr.msk.f32.gmra.mrb[4].mxu0 %vm196_vm0, %v173_v61  ;;  %880 = vmatprep.subr.bf16.mxu1 %v879_v57  ;;  %v517_v57 = vld [vmem:[%s1550_s2 + $0x2f8] sm:$0xff]  ;;  %v961_v62 = vpack.c.bf16 %v512_v54, %v510_v53  ;;  %v466_v42 = vld [vmem:[%s1550_s2 + $0x160] sm:$0xff]  ;;  %v476_v4 = vld [vmem:[%s1550_s2 + $0x1b0] sm:$0xff] }
  0x28   : > { %850 = vmatmul.mubr.msk.f32.gmra.mrb[4].mxu1 %vm196_vm0, %v173_v61  ;;  %294 = vmatprep.mubr.f32.mxu0 %v1048_v0  ;;  %v457_v61 = vld [vmem:[%s1550_s2 + $0x118] sm:$0xff]  ;;  %v963_v63 = vpack.c.bf16 %v517_v57, %v515_v55  ;;  %v917_v48 = vpack.c.bf16 %v468_v43, %v466_v42  ;;  %v530_v49 = vld [vmem:[%s1550_s2 + $0x360] sm:$0xff]  ;;  %v472_v55 = vld [vmem:[%s1550_s2 + $0x190] sm:$0xff] }
  0x29   : > { %389 = vmatprep.mubr.f32.mxu1 %v1048_v0  ;;  %942 = vmatpush1.bf16.msra.mxu0 %v941_v1  ;;  %v901_v1 = vpack.c.bf16 %v452_v59, %v450_v58  ;;  %v903_v5 = vpack.c.bf16 %v457_v61, %v455_v60  ;;  %v533_v41 = vld [vmem:[%s1550_s2 + $0x378] sm:$0xff]  ;;  %v470_v54 = vld [vmem:[%s1550_s2 + $0x180] sm:$0xff] }
  0x2a   : > { %944 = vmatprep.subr.bf16.mxu0 %v943_v2  ;;  %882 = vmatpush1.bf16.msra.mxu1 %v881_v3  ;;  %v514_v2 = vld [vmem:[%s1550_s2 + $0x2e0] sm:$0xff]  ;;  %v516_v3 = vld [vmem:[%s1550_s2 + $0x2f0] sm:$0xff]  ;;  %v473_v45 = vld [vmem:[%s1550_s2 + $0x198] sm:$0xff]  ;;  %v921_v60 = vpack.c.bf16 %v472_v55, %v470_v54 }
  0x2b   : > { %846 = vmatmul.mubr.msk.f32.gmra.mrb[6].mxu0 %vm196_vm0, %v174_v11  ;;  %884 = vmatprep.subr.bf16.mxu1 %v883_v7  ;;  %v454_v7 = vld [vmem:[%s1550_s2 + $0x100] sm:$0xff]  ;;  %v537_v53 = vld [vmem:[%s1550_s2 + $0x398] sm:$0xff] }
  0x2c   : > { %851 = vmatmul.mubr.msk.f32.gmra.mrb[6].mxu1 %vm196_vm0, %v174_v11  ;;  %300 = vmatprep.mubr.f32.mxu0 %v1048_v0  ;;  %v965_v11 = vpack.c.bf16 %v516_v3, %v514_v2  ;;  %v905_v13 = vpack.c.bf16 %v456_v8, %v454_v7  ;;  %v477_v57 = vld [vmem:[%s1550_s2 + $0x1b8] sm:$0xff]  ;;  %v534_v61 = vld [vmem:[%s1550_s2 + $0x380] sm:$0xff] }
  0x2d   : > { %395 = vmatprep.mubr.f32.mxu1 %v1048_v0  ;;  %946 = vmatpush1.bf16.msra.mxu0 %v945_v14  ;;  %v891_v0 = vpack.c.bf16 %v445_v26, %v443_v25  ;;  %v518_v14 = vld [vmem:[%s1550_s2 + $0x300] sm:$0xff]  ;;  %v541_v2 = vld [vmem:[%s1550_s2 + $0x3b8] sm:$0xff] }
  0x2e   : > { %948 = vmatprep.subr.bf16.mxu0 %v947_v15  ;;  %886 = vmatpush1.bf16.msra.mxu1 %v885_v16  ;;  %v520_v15 = vld [vmem:[%s1550_s2 + $0x310] sm:$0xff]  ;;  %v523_v16 = vld [vmem:[%s1550_s2 + $0x328] sm:$0xff]  ;;  %v522_v26 = vld [vmem:[%s1550_s2 + $0x320] sm:$0xff] }
  0x2f   : > { %847 = vmatmul.mubr.msk.f32.gmra.mrb[8].mxu0 %vm196_vm0, %v175_v24  ;;  %888 = vmatprep.subr.bf16.mxu1 %v887_v20  ;;  %v460_v20 = vld [vmem:[%s1550_s2 + $0x130] sm:$0xff]  ;;  %v969_v23 = vpack.c.bf16 %v520_v15, %v518_v14  ;;  %v474_v3 = vld [vmem:[%s1550_s2 + $0x1a0] sm:$0xff]  ;;  %v481_v6 = vld [vmem:[%s1550_s2 + $0x1d8] sm:$0xff] }
  0x30   : > { %852 = vmatmul.mubr.msk.f32.gmra.mrb[8].mxu1 %vm196_vm0, %v175_v24  ;;  %v971_v24 = vpack.c.bf16 %v525_v18, %v523_v16  ;;  %v909_v25 = vpack.c.bf16 %v460_v20, %v458_v19  ;;  %v925_v9 = vpack.c.bf16 %v476_v4, %v474_v3  ;;  %v538_v10 = vld [vmem:[%s1550_s2 + $0x3a0] sm:$0xff]  ;;  %v545_v14 = vld [vmem:[%s1550_s2 + $0x3d8] sm:$0xff]  ;;  %v480_v16 = vld [vmem:[%s1550_s2 + $0x1d0] sm:$0xff] }
  0x31   : > { %950 = vmatpush1.bf16.msra.mxu0 %v949_v27  ;;  %v524_v27 = vld [vmem:[%s1550_s2 + $0x330] sm:$0xff]  ;;  %v478_v15 = vld [vmem:[%s1550_s2 + $0x1c0] sm:$0xff] }
  0x32   : > { %952 = vmatprep.subr.bf16.mxu0 %v951_v28  ;;  %890 = vmatpush1.bf16.msra.mxu1 %v889_v29  ;;  %v527_v28 = vld [vmem:[%s1550_s2 + $0x348] sm:$0xff]  ;;  %v911_v29 = vpack.c.bf16 %v465_v22, %v463_v21  ;;  %v973_v34 = vpack.c.bf16 %v524_v27, %v522_v26  ;;  %v929_v19 = vpack.c.bf16 %v480_v16, %v478_v15  ;;  %v542_v20 = vld [vmem:[%s1550_s2 + $0x3c0] sm:$0xff]  ;;  %v544_v21 = vld [vmem:[%s1550_s2 + $0x3d0] sm:$0xff] }
  0x33   : > { %892 = vmatprep.subr.bf16.mxu1 %v891_v0  ;;  %v467_v0 = vld [vmem:[%s1550_s2 + $0x168] sm:$0xff]  ;;  %v975_v35 = vpack.c.bf16 %v529_v30, %v527_v28  ;;  %v993_v22 = vpack.c.bf16 %v544_v21, %v542_v20  ;;  %v549_v27 = vld [vmem:[%s1550_s2 + $0x3f8] sm:$0xff]  ;;  %v482_v28 = vld [vmem:[%s1550_s2 + $0x1e0] sm:$0xff] }
  0x34   : > { %v546_v32 = vld [vmem:[%s1550_s2 + $0x3e0] sm:$0xff] }
  0x35   : > { %954 = vmatpush1.bf16.msra.mxu0 %v953_v38  ;;  %v528_v38 = vld [vmem:[%s1550_s2 + $0x350] sm:$0xff] }
  0x36   : > { %956 = vmatprep.subr.bf16.mxu0 %v955_v39  ;;  %894 = vmatpush1.bf16.msra.mxu1 %v893_v40  ;;  %v531_v39 = vld [vmem:[%s1550_s2 + $0x368] sm:$0xff]  ;;  %v915_v40 = vpack.c.bf16 %v469_v33, %v467_v0  ;;  %v977_v46 = vpack.c.bf16 %v528_v38, %v526_v37  ;;  %v548_v0 = vld [vmem:[%s1550_s2 + $0x3f0] sm:$0xff] }
  0x37   : > { %896 = vmatprep.subr.bf16.mxu1 %v895_v44  ;;  %v471_v44 = vld [vmem:[%s1550_s2 + $0x188] sm:$0xff]  ;;  %v979_v47 = vpack.c.bf16 %v533_v41, %v531_v39  ;;  %v997_v33 = vpack.c.bf16 %v548_v0, %v546_v32 }
  0x39   : > { %958 = vmatpush1.bf16.msra.mxu0 %v957_v50  ;;  %v532_v50 = vld [vmem:[%s1550_s2 + $0x370] sm:$0xff] }
  0x3a   : > { %960 = vmatprep.subr.bf16.mxu0 %v959_v51  ;;  %898 = vmatpush1.bf16.msra.mxu1 %v897_v52  ;;  %v535_v51 = vld [vmem:[%s1550_s2 + $0x388] sm:$0xff]  ;;  %v919_v52 = vpack.c.bf16 %v473_v45, %v471_v44  ;;  %v981_v58 = vpack.c.bf16 %v532_v50, %v530_v49 }
  0x3b   : > { %900 = vmatprep.subr.bf16.mxu1 %v899_v56  ;;  %v475_v56 = vld [vmem:[%s1550_s2 + $0x1a8] sm:$0xff]  ;;  %v983_v59 = vpack.c.bf16 %v537_v53, %v535_v51 }
  0x3d   : > { %962 = vmatpush1.bf16.msra.mxu0 %v961_v62  ;;  %v536_v62 = vld [vmem:[%s1550_s2 + $0x390] sm:$0xff] }
  0x3e   : > { %964 = vmatprep.subr.bf16.mxu0 %v963_v63  ;;  %902 = vmatpush1.bf16.msra.mxu1 %v901_v1  ;;  %v539_v63 = vld [vmem:[%s1550_s2 + $0x3a8] sm:$0xff]  ;;  %v923_v1 = vpack.c.bf16 %v477_v57, %v475_v56  ;;  %v985_v7 = vpack.c.bf16 %v536_v62, %v534_v61 }
  0x3f   : > { %904 = vmatprep.subr.bf16.mxu1 %v903_v5  ;;  %v479_v5 = vld [vmem:[%s1550_s2 + $0x1c8] sm:$0xff]  ;;  %v987_v8 = vpack.c.bf16 %v541_v2, %v539_v63 }
  0x41   : > { %966 = vmatpush1.bf16.msra.mxu0 %v965_v11  ;;  %v540_v11 = vld [vmem:[%s1550_s2 + $0x3b0] sm:$0xff] }
  0x42   : > { %968 = vmatprep.subr.bf16.mxu0 %v967_v12  ;;  %906 = vmatpush1.bf16.msra.mxu1 %v905_v13  ;;  %v543_v12 = vld [vmem:[%s1550_s2 + $0x3c8] sm:$0xff]  ;;  %v927_v13 = vpack.c.bf16 %v481_v6, %v479_v5 }
  0x43   : > { %908 = vmatprep.subr.bf16.mxu1 %v907_v17  ;;  %v989_v17 = vpack.c.bf16 %v540_v11, %v538_v10  ;;  %v991_v18 = vpack.c.bf16 %v545_v14, %v543_v12 }
  0x45   : > { %970 = vmatpush1.bf16.msra.mxu0 %v969_v23  ;;  %v483_v23 = vld [vmem:[%s1550_s2 + $0x1e8] sm:$0xff] }
  0x46   : > { %972 = vmatprep.subr.bf16.mxu0 %v971_v24  ;;  %910 = vmatpush1.bf16.msra.mxu1 %v909_v25  ;;  %v485_v24 = vld [vmem:[%s1550_s2 + $0x1f8] sm:$0xff]  ;;  %v547_v25 = vld [vmem:[%s1550_s2 + $0x3e8] sm:$0xff] }
  0x47   : > { %912 = vmatprep.subr.bf16.mxu1 %v911_v29  ;;  %v931_v26 = vpack.c.bf16 %v485_v24, %v483_v23  ;;  %v484_v29 = vld [vmem:[%s1550_s2 + $0x1f0] sm:$0xff]  ;;  %v995_v30 = vpack.c.bf16 %v549_v27, %v547_v25 }
  0x48   : > { %v933_v31 = vpack.c.bf16 %v484_v29, %v482_v28 }
  0x49   : > { %974 = vmatpush1.bf16.msra.mxu0 %v973_v34 }
  0x4a   : > { %976 = vmatprep.subr.bf16.mxu0 %v975_v35  ;;  %914 = vmatpush1.bf16.msra.mxu1 %v913_v36 }
  0x4b   : > { %916 = vmatprep.subr.bf16.mxu1 %v915_v40 }
  0x4d   : > { %978 = vmatpush1.bf16.msra.mxu0 %v977_v46 }
  0x4e   : > { %980 = vmatprep.subr.bf16.mxu0 %v979_v47  ;;  %918 = vmatpush1.bf16.msra.mxu1 %v917_v48 }
  0x4f   : > { %920 = vmatprep.subr.bf16.mxu1 %v919_v52 }
  0x51   : > { %982 = vmatpush1.bf16.msra.mxu0 %v981_v58 }
  0x52   : > { %984 = vmatprep.subr.bf16.mxu0 %v983_v59  ;;  %922 = vmatpush1.bf16.msra.mxu1 %v921_v60 }
  0x53   : > { %924 = vmatprep.subr.bf16.mxu1 %v923_v1 }
  0x55   : > { %986 = vmatpush1.bf16.msra.mxu0 %v985_v7 }
  0x56   : > { %988 = vmatprep.subr.bf16.mxu0 %v987_v8  ;;  %926 = vmatpush1.bf16.msra.mxu1 %v925_v9 }
  0x57   : > { %928 = vmatprep.subr.bf16.mxu1 %v927_v13 }
  0x59   : > { %990 = vmatpush1.bf16.msra.mxu0 %v989_v17 }
  0x5a   : > { %992 = vmatprep.subr.bf16.mxu0 %v991_v18  ;;  %930 = vmatpush1.bf16.msra.mxu1 %v929_v19 }
  0x5b   : > { %932 = vmatprep.subr.bf16.mxu1 %v931_v26 }
  0x5d   : > { %994 = vmatpush1.bf16.msra.mxu0 %v993_v22 }
  0x5e   : > { %996 = vmatprep.subr.bf16.mxu0 %v995_v30  ;;  %934 = vmatpush1.bf16.msra.mxu1 %v933_v31 }
  0x61   : > { %998 = vmatpush1.bf16.msra.mxu0 %v997_v33 }
  0xf2   : > { %v278_v34 = vpop.f32.mrb[0].mxu0 }
  0xf3   : > { %v373_v35 = vpop.f32.mrb[0].mxu1  ;;  %v280_v36 = vpop.f32.mrb[1].mxu0  ;;  %v402_v39 = vmul.f32 %v278_v34, %v278_v34 }
  0xf4   : > { %v403_v37 = vmul.f32 %v280_v36, %v280_v36  ;;  %v375_v38 = vpop.f32.mrb[1].mxu1  ;;  %v404_v41 = vmul.f32 %v373_v35, %v373_v35 }
  0xf5   : > { %v405_v40 = vmul.f32 %v375_v38, %v375_v38 }
  0xf6   : > { %v284_v42 = vpop.f32.mrb[2].mxu0  ;;  %614 = vmatprep.mubr.f32.mxu1 %v403_v37 }
  0xf7   : > { %v379_v43 = vpop.f32.mrb[2].mxu1  ;;  %709 = vmatprep.mubr.f32.mxu0 %v405_v40  ;;  %v286_v44 = vpop.f32.mrb[3].mxu0  ;;  %615 = vmatmul.mubr.f32.vlgmr.msra.gmra.mrb[10].mxu1 %v402_v39  ;;  %v406_v47 = vmul.f32 %v284_v42, %v284_v42 }
  0xf8   : > { %v407_v45 = vmul.f32 %v286_v44, %v286_v44  ;;  %v381_v46 = vpop.f32.mrb[3].mxu1  ;;  %710 = vmatmul.mubr.f32.vlgmr.msra.gmra.mrb[10].mxu0 %v404_v41  ;;  %v408_v49 = vmul.f32 %v379_v43, %v379_v43 }
  0xf9   : > { %v409_v48 = vmul.f32 %v381_v46, %v381_v46 }
  0xfa   : > { %v290_v50 = vpop.f32.mrb[4].mxu0  ;;  %620 = vmatprep.mubr.f32.mxu1 %v407_v45 }
  0xfb   : > { %v385_v51 = vpop.f32.mrb[4].mxu1  ;;  %715 = vmatprep.mubr.f32.mxu0 %v409_v48  ;;  %v292_v52 = vpop.f32.mrb[5].mxu0  ;;  %621 = vmatmul.mubr.f32.gmra.mrb[12].mxu1 %v406_v47  ;;  %v410_v55 = vmul.f32 %v290_v50, %v290_v50 }
  0xfc   : > { %v411_v53 = vmul.f32 %v292_v52, %v292_v52  ;;  %v387_v54 = vpop.f32.mrb[5].mxu1  ;;  %716 = vmatmul.mubr.f32.gmra.mrb[12].mxu0 %v408_v49  ;;  %v412_v57 = vmul.f32 %v385_v51, %v385_v51 }
  0xfd   : > { %v413_v56 = vmul.f32 %v387_v54, %v387_v54 }
  0xfe   : > { %v296_v58 = vpop.f32.mrb[6].mxu0  ;;  %626 = vmatprep.mubr.f32.mxu1 %v411_v53 }
  0xff   : > { %v391_v59 = vpop.f32.mrb[6].mxu1  ;;  %721 = vmatprep.mubr.f32.mxu0 %v413_v56  ;;  %v298_v60 = vpop.f32.mrb[7].mxu0  ;;  %627 = vmatmul.mubr.f32.gmra.mrb[14].mxu1 %v410_v55  ;;  %v414_v63 = vmul.f32 %v296_v58, %v296_v58 }
 0x100   : > { %v415_v61 = vmul.f32 %v298_v60, %v298_v60  ;;  %v393_v62 = vpop.f32.mrb[7].mxu1  ;;  %722 = vmatmul.mubr.f32.gmra.mrb[14].mxu0 %v412_v57  ;;  %v416_v2 = vmul.f32 %v391_v59, %v391_v59 }
 0x101   : > { %v417_v1 = vmul.f32 %v393_v62, %v393_v62 }
 0x102   : > { %v302_v3 = vpop.f32.mrb[8].mxu0  ;;  %632 = vmatprep.mubr.f32.mxu1 %v415_v61 }
 0x103   : > { %v397_v4 = vpop.f32.mrb[8].mxu1  ;;  %727 = vmatprep.mubr.f32.mxu0 %v417_v1  ;;  %v304_v5 = vpop.f32.mrb[9].mxu0  ;;  %633 = vmatmul.mubr.f32.gmra.mrb[16].mxu1 %v414_v63  ;;  %v418_v8 = vmul.f32 %v302_v3, %v302_v3 }
 0x104   : > { %v419_v6 = vmul.f32 %v304_v5, %v304_v5  ;;  %v399_v7 = vpop.f32.mrb[9].mxu1  ;;  %728 = vmatmul.mubr.f32.gmra.mrb[16].mxu0 %v416_v2  ;;  %v420_v10 = vmul.f32 %v397_v4, %v397_v4 }
 0x105   : > { %v421_v9 = vmul.f32 %v399_v7, %v399_v7 }
 0x106   : > { %638 = vmatprep.mubr.f32.mxu1 %v419_v6 }
 0x107   : > { %733 = vmatprep.mubr.f32.mxu0 %v421_v9  ;;  %639 = vmatmul.mubr.f32.gmra.mrb[18].mxu1 %v418_v8 }
 0x108   : > { %734 = vmatmul.mubr.f32.gmra.mrb[18].mxu0 %v420_v10 }
 0x1ca   : > { %v616_v11 = vpop.f32.mrb[10].mxu1 }
 0x1cb   : > { %v711_v12 = vpop.f32.mrb[10].mxu0  ;;  %v618_v13 = vpop.f32.mrb[11].mxu1 }
 0x1cc   : > { %v712_v14 = vadd.f32 %v711_v12, %v616_v11  ;;  %v713_v15 = vpop.f32.mrb[11].mxu0 }
 0x1cd   : > { %v714_v16 = vadd.f32 %v713_v15, %v618_v13 }
 0x1ce   : > { %v740_v17 = vmax.f32 %v712_v14, 1e-06  ;;  %v622_v18 = vpop.f32.mrb[12].mxu1 }
 0x1cf   : > { %v741_v19 = vmax.f32 %v714_v16, 1e-06  ;;  %v717_v20 = vpop.f32.mrb[12].mxu0  ;;  %v624_v21 = vpop.f32.mrb[13].mxu1 }
 0x1d0   : > { %1020 = vlog2.f32 %v740_v17  ;;  %v718_v22 = vadd.f32 %v717_v20, %v622_v18  ;;  %v719_v23 = vpop.f32.mrb[13].mxu0 }
 0x1d1   : > { %1022 = vlog2.f32 %v741_v19  ;;  %v720_v24 = vadd.f32 %v719_v23, %v624_v21 }
 0x1d2   : > { %v742_v25 = vmax.f32 %v718_v22, 1e-06  ;;  %v628_v26 = vpop.f32.mrb[14].mxu1 }
 0x1d3   : > { %v743_v27 = vmax.f32 %v720_v24, 1e-06  ;;  %v723_v28 = vpop.f32.mrb[14].mxu0  ;;  %v630_v29 = vpop.f32.mrb[15].mxu1 }
 0x1d4   : > { %1024 = vlog2.f32 %v742_v25  ;;  %v724_v30 = vadd.f32 %v723_v28, %v628_v26  ;;  %v725_v31 = vpop.f32.mrb[15].mxu0 }
 0x1d5   : > { %1026 = vlog2.f32 %v743_v27  ;;  %v726_v32 = vadd.f32 %v725_v31, %v630_v29 }
 0x1d6   : > { %v744_v0 = vmax.f32 %v724_v30, 1e-06  ;;  %v634_v33 = vpop.f32.mrb[16].mxu1 }
 0x1d7   : > { %v745_v34 = vmax.f32 %v726_v32, 1e-06  ;;  %v729_v35 = vpop.f32.mrb[16].mxu0  ;;  %v636_v36 = vpop.f32.mrb[17].mxu1 }
 0x1d8   : > { %1028 = vlog2.f32 %v744_v0  ;;  %v730_v37 = vadd.f32 %v729_v35, %v634_v33  ;;  %v731_v38 = vpop.f32.mrb[17].mxu0 }
 0x1d9   : > { %1030 = vlog2.f32 %v745_v34  ;;  %v732_v39 = vadd.f32 %v731_v38, %v636_v36 }
 0x1da   : > { %v1021_v40 = vpop.eup %1020  ;;  %v746_v41 = vmax.f32 %v730_v37, 1e-06  ;;  %v640_v42 = vpop.f32.mrb[18].mxu1 }
 0x1db   : > { %v1023_v43 = vpop.eup %1022  ;;  %v751_v44 = vmul.f32 0.6931472, %v1021_v40  ;;  %v747_v45 = vmax.f32 %v732_v39, 1e-06  ;;  %v735_v46 = vpop.f32.mrb[18].mxu0 }
 0x1dc   : > { %v642_v47 = vpop.f32.mrb[19].mxu1  ;;  %v753_v48 = vmul.f32 0.6931472, %v1023_v43  ;;  %1032 = vlog2.f32 %v746_v41  ;;  %v736_v49 = vadd.f32 %v735_v46, %v640_v42  ;;  %v737_v50 = vpop.f32.mrb[19].mxu0 }
 0x1dd   : > { %770 = vst [vmem:[%s1528_s10] sm:$0xff] %v751_v44  ;;  %1034 = vlog2.f32 %v747_v45  ;;  %v738_v51 = vadd.f32 %v737_v50, %v642_v47 }
 0x1de   : > { %v1025_v52 = vpop.eup %1024  ;;  %772 = vst.msk [vmem:[%s1528_s10 + $0x8] sm:$0xff] %vm771_vm1, %v753_v48  ;;  %v748_v53 = vmax.f32 %v736_v49, 1e-06 }
 0x1df   : > { %v1027_v54 = vpop.eup %1026  ;;  %v755_v55 = vmul.f32 0.6931472, %v1025_v52  ;;  %v749_v56 = vmax.f32 %v738_v51, 1e-06 }
 0x1e0   : > { %v757_v57 = vmul.f32 0.6931472, %v1027_v54  ;;  %1036 = vlog2.f32 %v748_v53 }
 0x1e1   : > { %773 = vst [vmem:[%s1528_s10 + $0x10] sm:$0xff] %v755_v55  ;;  %1038 = vlog2.f32 %v749_v56 }
 0x1e2   : > { %v1029_v58 = vpop.eup %1028  ;;  %774 = vst.msk [vmem:[%s1528_s10 + $0x18] sm:$0xff] %vm771_vm1, %v757_v57 }
 0x1e3   : > { %v1031_v59 = vpop.eup %1030  ;;  %v759_v60 = vmul.f32 0.6931472, %v1029_v58 }
 0x1e4   : > { %v761_v61 = vmul.f32 0.6931472, %v1031_v59 }
 0x1e5   : > { %775 = vst [vmem:[%s1528_s10 + $0x20] sm:$0xff] %v759_v60 }
 0x1e6   : > { %v1033_v62 = vpop.eup %1032  ;;  %776 = vst.msk [vmem:[%s1528_s10 + $0x28] sm:$0xff] %vm771_vm1, %v761_v61 }
 0x1e7   : > { %v1035_v63 = vpop.eup %1034  ;;  %v763_v1 = vmul.f32 0.6931472, %v1033_v62 }
 0x1e8   : > { %v765_v2 = vmul.f32 0.6931472, %v1035_v63 }
 0x1e9   : > { %777 = vst [vmem:[%s1528_s10 + $0x30] sm:$0xff] %v763_v1 }
 0x1ea   : > { %v1037_v3 = vpop.eup %1036  ;;  %778 = vst.msk [vmem:[%s1528_s10 + $0x38] sm:$0xff] %vm771_vm1, %v765_v2 }
 0x1eb   : > { %v1039_v4 = vpop.eup %1038  ;;  %v767_v5 = vmul.f32 0.6931472, %v1037_v3 }
 0x1ec   : > { %v769_v6 = vmul.f32 0.6931472, %v1039_v4 }
 0x1ed   : > { %779 = vst [vmem:[%s1528_s10 + $0x40] sm:$0xff] %v767_v5 }
 0x1ee   : > { %780 = vst.msk [vmem:[%s1528_s10 + $0x48] sm:$0xff] %vm771_vm1, %v769_v6 }
 0x1ef PF: > { %s13_s12 = sadd.s32 1, %s1046_s12  }
 0x1f0   : > { %p10_p4 = scmp.ge.s32.totalorder %s13_s12, 4  }
 0x1f2   :  { %12 = sbr.rel (!%p10_p4) target bundleno = 1 (0x1), region = 62 }

</bundles_post_ra>
